<compile_context>
chip_gen: v7x
topology: tpu7x:2x2x1
jax: 0.10.0
libtpu: 0.0.40
codegen_flags: <defaults>
</compile_context>

<pallas_src>
import functools

import jax
import jax.numpy as jnp
import numpy as np
from jax import lax
from jax.experimental import pallas as pl
from jax.experimental.pallas import tpu as pltpu

EPS_WS = 1e-5   # weight-standardization eps (float32 input path in PyTorch)
EPS_GN = 1e-5   # nn.GroupNorm default eps


def _silu(x):
    # x * sigmoid(x); sigmoid -> lax.logistic rides the EUP slot.
    return x * jax.nn.sigmoid(x)


def _round_up(x, m):
    return ((x + m - 1) // m) * m


# ----------------------------------------------------------------------------
# Small one-shot Pallas kernels (weight standardization, time-emb MLP)
# ----------------------------------------------------------------------------
def _ws_kernel(w_ref, o_ref):
    # Weight standardization, hoisted out of the conv (runs once per weight).
    w = w_ref[...]                                   # (9*Cin, Cout) f32
    m = jnp.mean(w, axis=0, keepdims=True)
    d = w - m
    v = jnp.mean(d * d, axis=0, keepdims=True)       # unbiased=False
    o_ref[...] = (d * lax.rsqrt(v + EPS_WS)).astype(o_ref.dtype)


def _mlp_kernel(t_ref, w_ref, b_ref, o_ref):
    # nn.Sequential(SiLU, Linear) on the time embedding (lane-dense, padded N).
    t = _silu(t_ref[...])
    o_ref[...] = (
        jnp.dot(t, w_ref[...], preferred_element_type=jnp.float32) + b_ref[...]
    )


def ws_standardize(w2d, out_dtype):
    return pl.pallas_call(
        _ws_kernel,
        out_shape=jax.ShapeDtypeStruct(w2d.shape, out_dtype),
    )(w2d)


def mlp_forward(time_emb, wm, bm):
    B = time_emb.shape[0]
    n = wm.shape[1]
    return pl.pallas_call(
        _mlp_kernel,
        out_shape=jax.ShapeDtypeStruct((B, n), jnp.float32),
    )(time_emb, wm, bm.reshape(1, n))


# ----------------------------------------------------------------------------
# Fused ResnetBlock kernel (block1 + block2 + 1x1 residual, one grid step / batch)
# ----------------------------------------------------------------------------
def _fused_kernel(x_ref, w1_ref, b1_ref, g1_ref, be1_ref, scale_ref, shift_ref,
                  w2_ref, b2_ref, g2_ref, be2_ref, wr_ref, br_ref, P_ref,
                  o_ref, h_ref, *scratch,
                  H, W, Wp, Cin, Cp, sft, fold1):
    col_ref = scratch[0] if scratch else None
    HWp = H * Wp
    Nh = h_ref.shape[0]
    interior = Wp + 1 + sft            # sft chosen so interior % 8 == 0

    # Valid-column mask at its use shape, computed once per step and reused
    # (replaces the lane-sparse DMA'd (HWp, 1) mask input).
    mask = ((lax.broadcasted_iota(jnp.int32, (HWp, Cp), 0) % Wp) < W
            ).astype(jnp.float32)
    P = P_ref[...]                                   # (Cp, Cp) group-average matrix

    def group_norm(y, g, be):
        ch_sum = jnp.sum(y * mask, axis=0, keepdims=True)                  # (1, Cp)
        mean_c = jnp.dot(ch_sum, P, preferred_element_type=jnp.float32)    # (1, Cp)
        d = y - mean_c
        ch_dev = jnp.sum(d * d * mask, axis=0, keepdims=True)
        var_c = jnp.dot(ch_dev, P, preferred_element_type=jnp.float32)
        return d * lax.rsqrt(var_c + EPS_GN) * g + be

    # ---- block 1: 3x3 WS-conv (folded im2col -> 1 matmul) + GN + scale/shift + SiLU
    if fold1:
        for kh in range(3):
            for kw in range(3):
                tap = kh * 3 + kw
                col_ref[:, pl.ds(tap * Cin, Cin)] = \
                    x_ref[0, pl.ds(kh * Wp + kw + sft, HWp), :]
        y1 = jnp.dot(col_ref[...], w1_ref[...],
                     preferred_element_type=jnp.float32)                   # (HWp, Cp)
    else:
        y1 = None
        for kh in range(3):
            for kw in range(3):
                tap = kh * 3 + kw
                xs = x_ref[0, pl.ds(kh * Wp + kw + sft, HWp), :]
                wt = w1_ref[pl.ds(tap * Cin, Cin), :]
                p = jnp.dot(xs, wt, preferred_element_type=jnp.float32)
                y1 = p if y1 is None else y1 + p
    y1 = y1 + b1_ref[...]
    y1 = group_norm(y1, g1_ref[...], be1_ref[...])
    y1 = y1 * (scale_ref[0] + 1.0) + shift_ref[0]
    h1 = (_silu(y1) * mask).astype(h_ref.dtype)      # junk cols -> exact pad zeros

    # scatter h1 into block2's padded-flat layout; the junk columns land exactly
    # on block2's pad columns (left/right) and the border rows are zeroed.
    tail_start = interior + HWp
    h_ref[pl.ds(0, interior), :] = jnp.zeros((interior, Cp), h_ref.dtype)
    h_ref[pl.ds(interior, HWp), :] = h1
    h_ref[pl.ds(tail_start, Nh - tail_start), :] = jnp.zeros(
        (Nh - tail_start, Cp), h_ref.dtype)

    # ---- block 2: 3x3 WS-conv (9 accumulating K=Cp matmuls) + GN + SiLU
    y2 = None
    for kh in range(3):
        for kw in range(3):
            tap = kh * 3 + kw
            hs = h_ref[pl.ds(kh * Wp + kw + sft, HWp), :]
            wt = w2_ref[pl.ds(tap * Cp, Cp), :]
            p = jnp.dot(hs, wt, preferred_element_type=jnp.float32)
            y2 = p if y2 is None else y2 + p
    y2 = y2 + b2_ref[...]
    y2 = group_norm(y2, g2_ref[...], be2_ref[...])
    h2 = _silu(y2)

    # ---- fused 1x1 residual conv on the original input + add
    xr = x_ref[0, pl.ds(interior, HWp), :]
    res = jnp.dot(xr, wr_ref[...], preferred_element_type=jnp.float32) + br_ref[...]
    out = h2 + res                                   # (HWp, Cp) f32

    # ---- compact the junk columns away inside the kernel (H row stores)
    for h in range(H):
        o_ref[0, pl.ds(h * W, W), :] = out[h * Wp:h * Wp + W, :]


# ----------------------------------------------------------------------------
# Wrappers (glue: cheap pad/reshape + pallas_call plumbing)
# ----------------------------------------------------------------------------
def _pad_flatten(x, Wp, sft, dtype):
    """(B,H,W,C) -> (B, sft + (H+3)*Wp, C): +1 zero ring (extra right/bottom pad
    so every shifted conv slab stays in bounds), row-major flattened, plus a
    sft-entry flat front pad so the interior starts sublane-aligned."""
    B, H, W, C = x.shape
    xp = jnp.pad(x, ((0, 0), (1, 2), (1, Wp - W - 1), (0, 0)))
    flat = xp.reshape(B, (H + 3) * Wp, C)
    flat = jnp.pad(flat, ((0, 0), (sft, 0), (0, 0)))
    return flat.astype(dtype)


def _group_avg_matrix(c_out, c_pad, groups, hw):
    """(Cp, Cp) matrix P so that ch_sum @ P gives the per-channel group mean
    contribution; zero rows/cols for padded channels."""
    cpg = c_out // groups
    c = np.arange(c_pad)
    same = (c[:, None] // cpg) == (c[None, :] // cpg)
    real = (c[:, None] < c_out) & (c[None, :] < c_out)
    return jnp.asarray((same & real).astype(np.float32) / float(hw * cpg))


def _compiler_params(block_bytes):
    # Generation-aware VMEM cap: ~3/4 of physical (48 MiB on v7x, 96 MiB on
    # v5e/v6e), never below the 32 MiB default.
    try:
        phys = pltpu.get_tpu_info().vmem_capacity_bytes
    except Exception:
        phys = 64 << 20                      # conservative (v7x) fallback
    cap = max(int(phys * 3 // 4), 32 << 20)
    vmem = int(min(max(2 * block_bytes + (8 << 20), 32 << 20), cap))
    return pltpu.CompilerParams(dimension_semantics=("parallel",),
                                vmem_limit_bytes=vmem)


def fused_resnet_block(x_pad, w1, b1, g1, be1, scale, shift,
                       w2, b2, g2, be2, wr, br, P,
                       *, H, W, Wp, Cp, sft, mxu_dtype):
    B, Nx, Cin = x_pad.shape
    HW, HWp = H * W, H * Wp
    K1 = 9 * Cin
    # Fold the 9 taps into one matmul only while 9*Cin fits a single MXU K tile.
    # (v5e would prefer <=128; 256 matches v6e/v7x and is fine on v5e too.)
    fold1 = K1 <= 256
    isz = jnp.dtype(mxu_dtype).itemsize

    kernel = functools.partial(_fused_kernel, H=H, W=W, Wp=Wp, Cin=Cin, Cp=Cp,
                               sft=sft, fold1=fold1)
    scratch = [pltpu.VMEM((Nx, Cp), mxu_dtype)]            # h (block2 input) scratch
    if fold1:
        scratch.append(pltpu.VMEM((HWp, K1), mxu_dtype))   # block1 im2col slab

    blk_bytes = (Nx * Cin * isz + K1 * Cp * isz + 9 * Cp * Cp * isz
                 + Cin * Cp * isz + Cp * Cp * 4 + 12 * Cp * 4
                 + HW * Cp * 4                              # output block
                 + Nx * Cp * isz                            # h scratch
                 + (HWp * K1 * isz if fold1 else 0)         # im2col scratch
                 + 4 * HWp * Cp * 4)                        # live f32 temporaries

    cvec = lambda b: (0, 0)
    return pl.pallas_call(
        kernel,
        out_shape=jax.ShapeDtypeStruct((B, HW, Cp), jnp.float32),
        grid=(B,),
        in_specs=[
            pl.BlockSpec((1, Nx, Cin), lambda b: (b, 0, 0)),     # x_pad
            pl.BlockSpec((K1, Cp), cvec),                        # w1 (std, padded)
            pl.BlockSpec((1, Cp), cvec),                         # b1
            pl.BlockSpec((1, Cp), cvec),                         # gamma1
            pl.BlockSpec((1, Cp), cvec),                         # beta1
            pl.BlockSpec((1, 1, Cp), lambda b: (b, 0, 0)),       # scale (per batch)
            pl.BlockSpec((1, 1, Cp), lambda b: (b, 0, 0)),       # shift (per batch)
            pl.BlockSpec((9 * Cp, Cp), cvec),                    # w2 (std, padded)
            pl.BlockSpec((1, Cp), cvec),                         # b2
            pl.BlockSpec((1, Cp), cvec),                         # gamma2
            pl.BlockSpec((1, Cp), cvec),                         # beta2
            pl.BlockSpec((Cin, Cp), cvec),                       # res 1x1 weight
            pl.BlockSpec((1, Cp), cvec),                         # res bias
            pl.BlockSpec((Cp, Cp), cvec),                        # group-average matrix
        ],
        out_specs=pl.BlockSpec((1, HW, Cp), lambda b: (b, 0, 0)),
        scratch_shapes=scratch,
        compiler_params=_compiler_params(blk_bytes),
    )(x_pad, w1, b1, g1, be1, scale, shift, w2, b2, g2, be2, wr, br, P)


def resnet_block_forward(params, x_nhwc, time_emb, groups, mxu_dtype=jnp.bfloat16):
    B, H, W, Cin = x_nhwc.shape
    Cout = params["w1"].shape[-1]
    tdim = params["wm"].shape[0]
    Cp = _round_up(max(Cout, 128), 128)     # lane-dense channel padding
    Wp = _round_up(W + 2, 8)                # 8-aligned row pitch
    sft = (-(Wp + 1)) % 8                   # front shift -> interior 8-aligned
    HW = H * W

    # ---- time-embedding MLP -> (scale, shift), already in padded channel layout
    wm_p = jnp.zeros((tdim, 2 * Cp), jnp.float32)
    wm_p = wm_p.at[:, :Cout].set(params["wm"][:, :Cout])
    wm_p = wm_p.at[:, Cp:Cp + Cout].set(params["wm"][:, Cout:])
    bm_p = jnp.zeros((2 * Cp,), jnp.float32)
    bm_p = bm_p.at[:Cout].set(params["bm"][:Cout])
    bm_p = bm_p.at[Cp:Cp + Cout].set(params["bm"][Cout:])
    temb = mlp_forward(time_emb, wm_p, bm_p)                    # (B, 2*Cp)
    scale = temb[:, :Cp].reshape(B, 1, Cp)
    shift = temb[:, Cp:].reshape(B, 1, Cp)

    # ---- hoisted weight standardization (runs once), padded + cast to MXU dtype
    w1_std = ws_standardize(params["w1"].reshape(9 * Cin, Cout), mxu_dtype)
    w1_p = jnp.pad(w1_std, ((0, 0), (0, Cp - Cout)))            # (9*Cin, Cp)
    w2_std = ws_standardize(params["w2"].reshape(9 * Cout, Cout), mxu_dtype)
    w2_p = jnp.pad(w2_std.reshape(9, Cout, Cout),
                   ((0, 0), (0, Cp - Cout), (0, Cp - Cout))).reshape(9 * Cp, Cp)
    wr_p = jnp.pad(params["wr"], ((0, 0), (0, Cp - Cout))).astype(mxu_dtype)

    def padc(v):  # (Cout,) -> (1, Cp) f32
        return jnp.pad(v, (0, Cp - Cout)).reshape(1, Cp).astype(jnp.float32)

    P = _group_avg_matrix(Cout, Cp, groups, HW)
    x_pad = _pad_flatten(x_nhwc, Wp, sft, mxu_dtype)            # (B, Nx, Cin)

    out_p = fused_resnet_block(
        x_pad, w1_p, padc(params["b1"]), padc(params["g1"]), padc(params["be1"]),
        scale, shift,
        w2_p, padc(params["b2"]), padc(params["g2"]), padc(params["be2"]),
        wr_p, padc(params["br"]), P,
        H=H, W=W, Wp=Wp, Cp=Cp, sft=sft, mxu_dtype=mxu_dtype)   # (B, HW, Cp) f32
    # channel slice is a no-op when Cout is already a multiple of 128
    return out_p.reshape(B, H, W, Cp)[..., :Cout]


# ----------------------------------------------------------------------------
# Deterministic parameter init (shapes follow the PyTorch __init__)
# ----------------------------------------------------------------------------
def init_params(key, dim, dim_out, time_emb_dim):
    ks = jax.random.split(key, 12)
    p = {}
    p["w1"] = 0.2 * jax.random.normal(ks[0], (3, 3, dim, dim_out), jnp.float32)
    p["b1"] = 0.05 * jax.random.normal(ks[1], (dim_out,), jnp.float32)
    p["g1"] = 1.0 + 0.1 * jax.random.normal(ks[2], (dim_out,), jnp.float32)
    p["be1"] = 0.1 * jax.random.normal(ks[3], (dim_out,), jnp.float32)
    p["w2"] = 0.2 * jax.random.normal(ks[4], (3, 3, dim_out, dim_out), jnp.float32)
    p["b2"] = 0.05 * jax.random.normal(ks[5], (dim_out,), jnp.float32)
    p["g2"] = 1.0 + 0.1 * jax.random.normal(ks[6], (dim_out,), jnp.float32)
    p["be2"] = 0.1 * jax.random.normal(ks[7], (dim_out,), jnp.float32)
    p["wm"] = 0.2 * jax.random.normal(ks[8], (time_emb_dim, 2 * dim_out), jnp.float32)
    p["bm"] = 0.05 * jax.random.normal(ks[9], (2 * dim_out,), jnp.float32)
    p["wr"] = 0.3 * jax.random.normal(ks[10], (dim, dim_out), jnp.float32)
    p["br"] = 0.05 * jax.random.normal(ks[11], (dim_out,), jnp.float32)
    return p


# ----------------------------------------------------------------------------
# Pure-JAX reference (mirrors the PyTorch forward)
# ----------------------------------------------------------------------------
def _ref_block(x, w_hwio, b, gamma, beta, groups, scale=None, shift=None):
    wm = jnp.mean(w_hwio, axis=(0, 1, 2), keepdims=True)
    wv = jnp.mean((w_hwio - wm) ** 2, axis=(0, 1, 2), keepdims=True)
    wn = (w_hwio - wm) * lax.rsqrt(wv + EPS_WS)
    y = lax.conv_general_dilated(
        x, wn, (1, 1), "SAME", dimension_numbers=("NHWC", "HWIO", "NHWC")) + b
    B, H, W, C = y.shape
    cpg = C // groups
    yg = y.reshape(B, H * W, groups, cpg)
    m = yg.mean(axis=(1, 3), keepdims=True)
    v = ((yg - m) ** 2).mean(axis=(1, 3), keepdims=True)
    y = ((yg - m) * lax.rsqrt(v + EPS_GN)).reshape(B, H, W, C)
    y = y * gamma + beta
    if scale is not None:
        y = y * (scale[:, None, None, :] + 1.0) + shift[:, None, None, :]
    return y * jax.nn.sigmoid(y)


def _ref_resnet(params, x, t, groups):
    Cout = params["w1"].shape[-1]
    tp = jax.nn.silu(t) @ params["wm"] + params["bm"]
    scale, shift = tp[:, :Cout], tp[:, Cout:]
    h = _ref_block(x, params["w1"], params["b1"], params["g1"], params["be1"],
                   groups, scale, shift)
    h = _ref_block(h, params["w2"], params["b2"], params["g2"], params["be2"],
                   groups)
    res = jnp.einsum("bhwc,co->bhwo", x, params["wr"]) + params["br"]
    return h + res


# ----------------------------------------------------------------------------
if __name__ == "__main__":
    def run_case(B, H, W, dim, dim_out, groups, time_emb_dim, seed, check_bf16):
        key = jax.random.PRNGKey(seed)
        kx, kt, kp = jax.random.split(key, 3)
        x = jax.random.normal(kx, (B, H, W, dim), jnp.float32)      # NHWC
        t = jax.random.normal(kt, (B, time_emb_dim), jnp.float32)
        params = init_params(kp, dim, dim_out, time_emb_dim)
        ref = _ref_resnet(params, x, t, groups)

        # exact-semantics check: f32 MXU operands / f32 intermediate
        out_f32 = jax.block_until_ready(
            resnet_block_forward(params, x, t, groups, mxu_dtype=jnp.float32))
        np.testing.assert_allclose(np.asarray(out_f32), np.asarray(ref),
                                   atol=2e-2, rtol=2e-2)

        if check_bf16:
            # fast path: bf16 MXU operands + bf16 x_pad / h intermediates,
            # f32 GroupNorm stats & epilogue (block2's GN sees bf16-rounded h).
            out_bf16 = jax.block_until_ready(
                resnet_block_forward(params, x, t, groups,
                                     mxu_dtype=jnp.bfloat16))
            np.testing.assert_allclose(np.asarray(out_bf16), np.asarray(ref),
                                       atol=1e-1, rtol=1e-1)

    # primary demo shape (PRNGKey(0))
    run_case(B=2, H=16, W=16, dim=4, dim_out=16, groups=8, time_emb_dim=32,
             seed=0, check_bf16=True)
    # layout guard: non-square, W not a multiple of 8 (junk-column scheme test)
    run_case(B=2, H=8, W=12, dim=4, dim_out=16, groups=8, time_emb_dim=32,
             seed=1, check_bf16=False)

    print("KERNEL_OK")
</pallas_src>

<mosaic_0001>
module attributes {stable_mosaic.version = 11 : i64} {
  func.func @_mlp_kernel(%arg0: memref<2x32xf32, #tpu.memory_space<vmem>>, %arg1: memref<32x256xf32, #tpu.memory_space<vmem>>, %arg2: memref<1x256xf32, #tpu.memory_space<vmem>>, %arg3: memref<2x256xf32, #tpu.memory_space<vmem>>) attributes {dimension_semantics = [], scalar_prefetch = 0 : i64, scratch_operands = 0 : i64, tpu.core_type = #tpu.core_type<tc>} {
    %c0 = arith.constant 0 : index
    %c0_0 = arith.constant 0 : index
    %0 = vector.load %arg0[%c0, %c0_0] : memref<2x32xf32, #tpu.memory_space<vmem>>, vector<2x32xf32>
    %1 = arith.negf %0 : vector<2x32xf32>
    %2 = math.exp %1 : vector<2x32xf32>
    %cst = arith.constant 1.000000e+00 : f32
    %3 = vector.broadcast %cst : f32 to vector<2x32xf32>
    %4 = arith.addf %3, %2 : vector<2x32xf32>
    %5 = arith.divf %3, %4 : vector<2x32xf32>
    %6 = arith.mulf %0, %5 : vector<2x32xf32>
    %c0_1 = arith.constant 0 : index
    %c0_2 = arith.constant 0 : index
    %7 = vector.load %arg1[%c0_1, %c0_2] : memref<32x256xf32, #tpu.memory_space<vmem>>, vector<32x256xf32>
    %cst_3 = arith.constant dense<0.000000e+00> : vector<2x256xf32>
    %8 = tpu.matmul %6, %7, %cst_3 {dimension_numbers = #tpu.dot_dimension_numbers<[1], [0], [0], [1], [0, 0, 1, 1], [], []>} : vector<2x32xf32>, vector<32x256xf32>, vector<2x256xf32> -> vector<2x256xf32>
    %c0_4 = arith.constant 0 : index
    %c0_5 = arith.constant 0 : index
    %9 = vector.load %arg2[%c0_4, %c0_5] : memref<1x256xf32, #tpu.memory_space<vmem>>, vector<1x256xf32>
    %10 = vector.broadcast %9 : vector<1x256xf32> to vector<2x256xf32>
    %11 = arith.addf %8, %10 : vector<2x256xf32>
    %c0_6 = arith.constant 0 : index
    %c0_7 = arith.constant 0 : index
    %12 = vector.load %arg3[%c0_6, %c0_7] : memref<2x256xf32, #tpu.memory_space<vmem>>, vector<2x256xf32>
    tpu.vector_store %arg3[%c0_6, %c0_7], %11 {strides = array<i32>} : memref<2x256xf32, #tpu.memory_space<vmem>>, vector<2x256xf32>,
    return
  }
}

</mosaic_0001>

<bundles_post_ra>
// kernel: tpu_custom_call.1
= control target key start
LH: loop header
LB: loop body
LE: loop exit
PB: predicated region body
PF: predicated region fallthrough
CT: control target
= control target key end

     0   :  { %8 = vsyncpa [#allocation3], 0  ;;  %s337_s0 = inlined_call_operand.hbm [shape: f32[2,32], index: 0, kind: input, shape index: {}]   ;;  %s338_s1 = inlined_call_operand.hbm [shape: f32[32,256], index: 1, kind: input, shape index: {}]   ;;  %s339_s2 = inlined_call_operand.vmem [shape: f32[1,256], index: 2, kind: input, shape index: {}]   ;;  %s340_s3 = inlined_call_operand.hbm [shape: f32[2,256], index: 3, kind: output, shape index: {}]  }
   0x1   :  { %9 = vsyncpa [#allocation6], 0 }
   0x2   :  { %10 = vsyncpa [#allocation4], 0  ;;  %s265_s12 = smov [#allocation2]   ;;  %s266_s14 = smov [#allocation5]  }
   0x3   :  { %s17_s13 = sshll.u32 %s265_s12, 4  ;;  %s26_s15 = sshll.u32 %s266_s14, 4  ;;  %s18_s13 = int_to_ptr.vmem [resolvable:$true] %s17_s13  ;;  %s291_s15 = int_to_ptr.vmem [resolvable:$true] %s26_s15 }
   0x4   :  { %s193_s18 = scalar_lea.hbm %s337_s0, 32 }
   0x5   :  { %p194_p0 = scmp.ne.s32.totalorder %s337_s0, %s193_s18  ;;  %p197_p1 = scmp.lt.u32.totalorder %s193_s18, %s337_s0 }
   0x7   :  { %p199_p2 = pnand %p197_p1, %p194_p0 }
   0x9   :  { %202 = shalt.err (!%p199_p2)
}
   0xa   :  { %s203_s23 = scalar_lea.vmem %s18_s13, 32  ;;  %p208_p4 = scmp.lt.s32.totalorder %s18_s13, %s18_s13 }
   0xb   :  { %p204_p3 = scmp.ne.s32.totalorder %s18_s13, %s203_s23  ;;  %p209_p5 = scmp.lt.s32.totalorder %s203_s23, %s203_s23 }
   0xd   :  { %p210_p6 = por %p209_p5, %p208_p4 }
   0xf   :  { %p211_p7 = pnand %p210_p6, %p204_p3 }
  0x11   :  { %214 = shalt.err (!%p211_p7)
}
  0x12   :  { %20 = dma.hbm_to_vmem [thread:$0]  %s337_s0, 32, %s18_s13, [#allocation3]  }
  0x13   :  { %s215_s28 = scalar_lea.hbm %s338_s1, 1024 }
  0x14   :  { %p216_p8 = scmp.ne.s32.totalorder %s338_s1, %s215_s28  ;;  %p219_p9 = scmp.lt.u32.totalorder %s215_s28, %s338_s1 }
  0x16   :  { %p221_p10 = pnand %p219_p9, %p216_p8 }
  0x18   :  { %224 = shalt.err (!%p221_p10)
}
  0x19   :  { %s225_s6 = scalar_lea.vmem %s291_s15, 1024  ;;  %p230_p12 = scmp.lt.s32.totalorder %s291_s15, %s291_s15 }
  0x1a   :  { %p226_p11 = scmp.ne.s32.totalorder %s291_s15, %s225_s6  ;;  %p231_p13 = scmp.lt.s32.totalorder %s225_s6, %s225_s6 }
  0x1c   :  { %p232_p0 = por %p231_p13, %p230_p12 }
  0x1e   :  { %p233_p1 = pnand %p232_p0, %p226_p11 }
  0x20   :  { %236 = shalt.err (!%p233_p1)
}
  0x21   :  { %s267_s0 = smov 256   ;;  %s268_s7 = smov 16  }
  0x22   :  { %32 = dma.hbm_to_vmem [thread:$0]  %s338_s1, 1024, %s291_s15, [#allocation6], %s267_s0, %s267_s0, %s268_s7  }
  0x23   :  { %259 = dma.done.wait [#allocation3], 32  }
  0x24   :  { %260 = vsyncadd [#allocation3], 4294967264 }
  0x25   :  { %261 = dma.done.wait [#allocation6], 1024  }
  0x26   :  { %262 = vsyncadd [#allocation6], 4294966272  ;;  %v269_v0 = vmov 0.0   ;;  %v50_v1 = vld [vmem:[#allocation5 + $0x8] sm:$0xff]  ;;  %v52_v2 = vld [vmem:[#allocation5 + $0x18] sm:$0xff]  ;;  %vm69_vm0 = vcmask 261120   ;;  %v59_v19 = vlaneseq }
  0x27   :  { %137 = vmatprep.mubr.f32.mxu0 %v269_v0  ;;  %v49_v3 = vld [vmem:[#allocation5] sm:$0xff]  ;;  %v175_v4 = vpack.c.bf16 %v52_v2, %v50_v1  ;;  %v51_v5 = vld [vmem:[#allocation5 + $0x10] sm:$0xff]  ;;  %v54_v6 = vld [vmem:[#allocation5 + $0x28] sm:$0xff]  ;;  %s270_s11 = smov [#allocation7]  }
  0x28   :  { %v56_v7 = vld [vmem:[#allocation5 + $0x38] sm:$0xff]  ;;  %v177_v8 = vpack.c.bf16 %v51_v5, %v49_v3  ;;  %v53_v10 = vld [vmem:[#allocation5 + $0x20] sm:$0xff]  ;;  %v55_v11 = vld [vmem:[#allocation5 + $0x30] sm:$0xff]  ;;  %v60_v20 = vshrl.u32 %v59_v19, 7  ;;  %s162_s12 = sshll.u32 %s270_s11, 4  ;;  %s163_s12 = int_to_ptr.vmem [resolvable:$true] %s162_s12 }
  0x29   :  { %v179_v9 = vpack.c.bf16 %v56_v7, %v54_v6  ;;  %v41_v12 = vld [vmem:[#allocation2] sm:$0x3]  ;;  %176 = vmatprep.subr.bf16.mxu0 %v175_v4  ;;  %v181_v14 = vpack.c.bf16 %v55_v11, %v53_v10  ;;  %s237_s13 = scalar_lea.vmem %s163_s12, 64  ;;  %p242_p3 = scmp.lt.s32.totalorder %s163_s12, %s163_s12 }
  0x2a   :  { %v172_v13 = vmul.f32 -1.442695, %v41_v12  ;;  %178 = vmatpush1.bf16.msra.mxu0 %v177_v8  ;;  %v61_v21 = vsub.s32 0, %v60_v20  ;;  %v57_v22 = vld [vmem:[%s339_s2] sm:$0x3]  ;;  %v65_v23 = vsub.s32 1, %v60_v20  ;;  %p238_p2 = scmp.ne.s32.totalorder %s163_s12, %s237_s13  ;;  %p243_p4 = scmp.lt.s32.totalorder %s237_s13, %s237_s13 }
  0x2b   :  { %180 = vmatprep.subr.bf16.mxu0 %v179_v9 }
  0x2c   :  { %189 = vpow2.f32 %v172_v13  ;;  %v62_v24 = vrot.slane %v57_v22, %v61_v21  ;;  %v66_v25 = vrot.slane %v57_v22, %v65_v23  ;;  %p244_p5 = por %p243_p4, %p242_p3 }
  0x2e   :  { %182 = vmatpush1.bf16.msra.mxu0 %v181_v14  ;;  %p245_p6 = pnand %p244_p5, %p238_p2 }
  0x36   :  { %v190_v15 = vpop.eup %189 }
  0x37   :  { %v45_v16 = vadd.f32 1.0, %v190_v15 }
  0x39   :  { %191 = vrcp.f32 %v45_v16 }
  0x43   :  { %v192_v17 = vpop.eup %191 }
  0x44   :  { %v48_v18 = vmul.f32 %v192_v17, %v41_v12 }
  0x46   :  { %173 = vmatmul.mubr.msk.f32.vlgmr.msra.gmra.mrb[0].mxu0 %vm69_vm0, %v48_v18 }
 0x119   :  { %v139_v26 = vpop.f32.mrb[0].mxu0 }
 0x11a   :  { %v140_v27 = vadd.f32 %v139_v26, %v62_v24  ;;  %v141_v28 = vpop.f32.mrb[1].mxu0 }
 0x11b   :  { %v142_v29 = vadd.f32 %v141_v28, %v66_v25 }
 0x11d   :  { %v146_v30 = vcombine.low %v140_v27, %v142_v29 }
 0x11f   :  { %174 = vst.sshfl [vmem:[#allocation7] sm:$0x33 pattern:$0x76325410] %v146_v30 }
 0x120   :  { %248 = shalt.err (!%p245_p6)
}
 0x121   :  { %s249_s15 = scalar_lea.hbm %s340_s3, 64 }
 0x122   :  { %p250_p7 = scmp.ne.s32.totalorder %s340_s3, %s249_s15  ;;  %p253_p8 = scmp.lt.u32.totalorder %s249_s15, %s340_s3 }
 0x124   :  { %p255_p9 = pnand %p253_p8, %p250_p7 }
 0x126   :  { %258 = shalt.err (!%p255_p9)
}
 0x127   :  { %165 = dma.vmem_to_hbm [thread:$0]  %s163_s12, 64, %s340_s3, [#allocation4]  }
 0x128   :  { %263 = dma.done.wait [#allocation4], 64  }
 0x129   :  { %264 = vsyncadd [#allocation4], 4294967232 }
 0x12a   :  { %169 = vsyncpa [#allocation3], 1 }
 0x12b   :  { %170 = vsyncpa [#allocation6], 1 }
 0x12c   :  { %171 = vsyncpa [#allocation4], 1 }

</bundles_post_ra>
